<compile_context>
chip_gen: v6e
topology: v6e:2x2x1
jax: 0.10.0
libtpu: 0.0.40
codegen_flags: <defaults>
</compile_context>

<pallas_src>
import numpy as np
import jax
import jax.numpy as jnp
from jax.experimental import pallas as pl
from jax.experimental.pallas import tpu as pltpu

PART_PAD = 8  # parts padded to one f32 sublane tile -> aligned stacking/stores


def _adaptive_pool_matrix(h, w, part, part_rows):
    """(part_rows, h*w) matrix P with P[p, hi*w+wi] = 1/(bin_size(p)*w) for hi in bin p.

    Folds F.adaptive_avg_pool2d(x, (part, 1)) (adaptive bins over H, mean over W)
    into one contraction over the flattened h*w axis.  Rows >= part are zero padding.
    """
    P = np.zeros((part_rows, h * w), dtype=np.float32)
    for p in range(part):
        s = (p * h) // part
        e = -((-(p + 1) * h) // part)          # ceil((p+1)*h/part)
        P[p, s * w:e * w] = 1.0 / ((e - s) * w)
    return P


def _softmax_last(z):
    m = jnp.max(z, axis=-1, keepdims=True)
    e = jnp.exp(z - m)
    return e * pl.reciprocal(jnp.sum(e, axis=-1, keepdims=True), approx=True)


def _pick_batch_tile(b):
    """Largest multiple-of-8 divisor of b (sublane-aligned (B_tile, c) output
    stores), capped so M = B_tile*PART_PAD stays near one 256-row MXU tile and
    the grid keeps >= 2 parallel steps (v7x megacore) when b allows."""
    cap = min(32, b // 2) if b >= 16 else b
    for cand in range(cap, 7, -1):
        if b % cand == 0 and cand % 8 == 0:
            return cand
    return b  # no aligned divisor: block == full batch dim (also layout-legal)


def _make_iwpa_kernel(b_tile, part, inter):
    def kernel(x_ref, pool_ref, wcat_ref, bcat_ref, mask_ref, g_ref, feat_ref,
               out_ref, pf_ref):
        pool = pool_ref[...]                                # (PART_PAD, hw) bf16

        # --- per-sample adaptive pooling (mem-bound, hidden under x DMA) ----
        for s in range(b_tile):                             # static unroll
            xs = x_ref[s].astype(jnp.bfloat16)              # (c, hw): in-VMEM bf16 cast
            pf_ref[pl.ds(s * PART_PAD, PART_PAD), :] = jax.lax.dot_general(
                pool, xs, (((1,), (1,)), ((), ())),
                preferred_element_type=jnp.float32)         # (PART_PAD, c)
        pf = pf_ref[...].astype(jnp.bfloat16)               # (b_tile*8, c)

        # --- fused fc1|fc2|fc3: ONE MXU matmul with M = b_tile*8 rows --------
        fcat = jnp.dot(pf, wcat_ref[...],
                       preferred_element_type=jnp.float32) + bcat_ref[...]
        f1 = fcat[:, :inter]
        f2 = fcat[:, inter:2 * inter]
        f3 = fcat[:, 2 * inter:]

        # --- batched part attention (block-diag mask keeps samples apart) ---
        scores = jax.lax.dot_general(f1, f2, (((1,), (1,)), ((), ())),
                                     preferred_element_type=jnp.float32)
        att = _softmax_last(scores + mask_ref[...])         # (rows, rows)

        # gate softmax hoisted to wrapper & folded into block-diag G; tail
        # reassociated as wp = (G @ att) @ f3.
        w_att = jnp.dot(g_ref[...], att, preferred_element_type=jnp.float32)
        wp = jnp.dot(w_att, f3, preferred_element_type=jnp.float32)  # (b_tile, inter)

        out_ref[...] = wp + feat_ref[...]

    return kernel


def iwpa_forward(x_nchw, feat, params, *, t, part):
    bt, c, h, w = x_nchw.shape
    assert bt % t == 0
    b = bt // t
    # The reference `.view(b, inter_channels, part)` after attention is only
    # shape-consistent when t == 1 (otherwise PyTorch itself raises).
    assert t == 1, "IWPA forward is only valid for t == 1"
    assert params["w1"].shape[0] == c
    inter = params["w1"].shape[1]
    assert inter == c, "residual `wp + feat` requires inter_channels == in_channels"
    assert part <= PART_PAD
    hw = h * w

    b_tile = _pick_batch_tile(b)
    rows = b_tile * PART_PAD

    # Free reshape (contiguous, NCHW kept); x stays f32 — bf16 cast happens in
    # VMEM inside the kernel (no extra HBM pass over the big activation).
    x_flat = x_nchw.reshape(bt, c, hw)

    # Pooling matrix with zero padding rows (part -> 8).
    pool = jnp.asarray(_adaptive_pool_matrix(h, w, part, PART_PAD)).astype(jnp.bfloat16)

    # fc1|fc2|fc3 fused into one (c, 3*inter) weight; biases stay f32.
    wcat = jnp.concatenate([params["w1"], params["w2"], params["w3"]],
                           axis=1).astype(jnp.bfloat16)
    bcat = jnp.concatenate([params["b1"], params["b2"], params["b3"]], axis=1)

    # Grid-invariant softmax(gate) folded into a block-diagonal (b_tile, rows) matrix.
    gate_sm = jax.nn.softmax(params["gate"][0])                           # (part,)
    gate_pad = jnp.zeros((PART_PAD,), jnp.float32).at[:part].set(gate_sm)
    gmat = jnp.kron(jnp.eye(b_tile, dtype=jnp.float32),
                    gate_pad.reshape(1, PART_PAD))                        # (b_tile, rows)

    # Additive mask: a query row may only attend to the REAL part rows of its
    # own sample (padding rows / other samples get -1e30 -> exp underflows to 0).
    blk = np.zeros((PART_PAD, PART_PAD), np.float32)
    blk[:, :part] = 1.0
    allow = np.kron(np.eye(b_tile, dtype=np.float32), blk)
    mask = jnp.asarray(np.where(allow > 0.5, 0.0, -1e30).astype(np.float32))

    kernel = _make_iwpa_kernel(b_tile, part, inter)

    wpf = pl.pallas_call(
        kernel,
        out_shape=jax.ShapeDtypeStruct((b, c), jnp.float32),
        grid_spec=pltpu.PrefetchScalarGridSpec(
            num_scalar_prefetch=0,
            grid=(b // b_tile,),
            in_specs=[
                pl.BlockSpec((b_tile, c, hw), lambda i: (i, 0, 0)),   # x (f32, per batch tile)
                pl.BlockSpec((PART_PAD, hw), lambda i: (0, 0)),       # pooling matrix
                pl.BlockSpec((c, 3 * inter), lambda i: (0, 0)),       # fused fc weights
                pl.BlockSpec((1, 3 * inter), lambda i: (0, 0)),       # fused fc biases
                pl.BlockSpec((rows, rows), lambda i: (0, 0)),         # block-diag attn mask
                pl.BlockSpec((b_tile, rows), lambda i: (0, 0)),       # block-diag gate matrix
                pl.BlockSpec((b_tile, c), lambda i: (i, 0)),          # feat (per batch tile)
            ],
            out_specs=pl.BlockSpec((b_tile, c), lambda i: (i, 0)),
            scratch_shapes=[pltpu.VMEM((rows, c), jnp.float32)],      # stacked pooled feats
        ),
        compiler_params=pltpu.CompilerParams(
            dimension_semantics=("parallel",),
            vmem_limit_bytes=48 * 1024 * 1024,
        ),
    )(x_flat, pool, wcat, bcat, mask, gmat, feat)

    # BatchNorm1d (training mode, biased batch variance) as plain jnp: wpf is
    # only (b, c) f32, so a second pallas_call was pure launch overhead.
    mu = jnp.mean(wpf, axis=0, keepdims=True)
    var = jnp.mean((wpf - mu) ** 2, axis=0, keepdims=True)
    return (wpf - mu) * jax.lax.rsqrt(var + 1e-5) * params["bn_gamma"] + params["bn_beta"]


def init_params(key, c, part):
    """Deterministic synthetic parameters (shapes match IWPA.__init__, inter=out=c)."""
    ks = jax.random.split(key, 7)
    s = 1.0 / np.sqrt(c)
    u = lambda k, shp: jax.random.uniform(k, shp, jnp.float32, -s, s)
    return {
        "w1": u(ks[0], (c, c)), "b1": u(ks[1], (1, c)),   # conv weight stored as (c_in, c_out)
        "w2": u(ks[2], (c, c)), "b2": u(ks[3], (1, c)),
        "w3": u(ks[4], (c, c)), "b3": u(ks[5], (1, c)),
        "gate": jnp.full((1, part), 1.0 / part, jnp.float32),
        "bn_gamma": (1.0 + 0.01 * jax.random.normal(ks[6], (1, c))).astype(jnp.float32),
        "bn_beta": jnp.zeros((1, c), jnp.float32),
    }


def iwpa_reference(x_nchw, feat, params, *, t, part):
    """Pure-JAX f32 mirror of the PyTorch forward (NCHW semantics) for validation."""
    bt, c, h, w = x_nchw.shape
    b = bt // t
    poolT = jnp.asarray(_adaptive_pool_matrix(h, w, part, part).T)       # (h*w, part) f32
    xf = x_nchw.reshape(bt, c, h * w)
    pfeat = jnp.einsum('bcx,xp->bcp', xf, poolT, precision='highest')    # (bt, c, part)
    pfeat = pfeat.reshape(b, t, c, part).transpose(0, 2, 1, 3)           # (b, c, t, part)

    def conv1x1(pf, wT, bias):
        out = jnp.einsum('bctp,ci->bitp', pf, wT, precision='highest')
        return out + bias[0][None, :, None, None]

    f1 = conv1x1(pfeat, params['w1'], params['b1']).reshape(b, c, -1)
    f2 = conv1x1(pfeat, params['w2'], params['b2']).reshape(b, c, -1)
    f3 = conv1x1(pfeat, params['w3'], params['b3']).reshape(b, c, -1)
    p1 = jnp.transpose(f1, (0, 2, 1))
    p3 = jnp.transpose(f3, (0, 2, 1))
    cpa = jax.nn.softmax(jnp.einsum('bni,bim->bnm', p1, f2, precision='highest'), axis=-1)
    refined = jnp.einsum('bnm,bmi->bni', cpa, p3, precision='highest')
    refined = jnp.transpose(refined, (0, 2, 1)).reshape(b, c, part)
    gate = jax.nn.softmax(params['gate'][0], axis=-1)
    wpf = jnp.einsum('bip,p->bi', refined, gate) + feat
    mu = jnp.mean(wpf, axis=0, keepdims=True)
    var = jnp.mean((wpf - mu) ** 2, axis=0, keepdims=True)
    return (wpf - mu) / jnp.sqrt(var + 1e-5) * params['bn_gamma'] + params['bn_beta']


if __name__ == "__main__":
    key = jax.random.PRNGKey(0)
    c, part, t = 32, 3, 1
    b, h, w = 8, 16, 16
    bt = b * t

    k1, k2, k3 = jax.random.split(key, 3)
    x = jax.random.normal(k1, (bt, c, h, w), jnp.float32)
    feat = jax.random.normal(k2, (b, c), jnp.float32)
    params = init_params(k3, c, part)

    out = iwpa_forward(x, feat, params, t=t, part=part)
    out = jax.block_until_ready(out)

    ref = iwpa_reference(x, feat, params, t=t, part=part)
    assert out.shape == (b, c)
    # bf16 pooling / fc operands + approx softmax reciprocal -> loose tolerance.
    np.testing.assert_allclose(np.asarray(out), np.asarray(ref), rtol=2e-2, atol=2e-2)
    print("KERNEL_OK")
</pallas_src>

<mosaic_0001>
module attributes {stable_mosaic.version = 11 : i64} {
  func.func @kernel(%arg0: i32, %arg1: memref<8x32x256xf32, #tpu.memory_space<vmem>>, %arg2: memref<8x256xbf16, #tpu.memory_space<vmem>>, %arg3: memref<32x96xbf16, #tpu.memory_space<vmem>>, %arg4: memref<1x96xf32, #tpu.memory_space<vmem>>, %arg5: memref<64x64xf32, #tpu.memory_space<vmem>>, %arg6: memref<8x64xf32, #tpu.memory_space<vmem>>, %arg7: memref<8x32xf32, #tpu.memory_space<vmem>>, %arg8: memref<8x32xf32, #tpu.memory_space<vmem>>, %arg9: memref<64x32xf32, #tpu.memory_space<vmem>>) attributes {dimension_semantics = [#tpu.dimension_semantics<parallel>], iteration_bounds = array<i64: 1>, scalar_prefetch = 0 : i64, scratch_operands = 1 : i64, tpu.core_type = #tpu.core_type<tc>, window_params = [{transform_indices = @transform_0, window_bounds = array<i64: 8, 32, 256>}, {pipeline_mode = #tpu.pipeline_mode<synchronous>, transform_indices = @transform_1, window_bounds = array<i64: 8, 256>}, {pipeline_mode = #tpu.pipeline_mode<synchronous>, transform_indices = @transform_2, window_bounds = array<i64: 32, 96>}, {pipeline_mode = #tpu.pipeline_mode<synchronous>, transform_indices = @transform_3, window_bounds = array<i64: 1, 96>}, {pipeline_mode = #tpu.pipeline_mode<synchronous>, transform_indices = @transform_4, window_bounds = array<i64: 64, 64>}, {pipeline_mode = #tpu.pipeline_mode<synchronous>, transform_indices = @transform_5, window_bounds = array<i64: 8, 64>}, {transform_indices = @transform_6, window_bounds = array<i64: 8, 32>}, {transform_indices = @transform_7, window_bounds = array<i64: 8, 32>}]} {
    %c0 = arith.constant 0 : index
    %c0_0 = arith.constant 0 : index
    %0 = vector.load %arg2[%c0, %c0_0] : memref<8x256xbf16, #tpu.memory_space<vmem>>, vector<8x256xbf16>
    %c0_1 = arith.constant 0 : index
    %c0_2 = arith.constant 0 : index
    %c0_3 = arith.constant 0 : index
    %1 = vector.load %arg1[%c0_1, %c0_2, %c0_3] : memref<8x32x256xf32, #tpu.memory_space<vmem>>, vector<1x32x256xf32>
    %2 = vector.shape_cast %1 : vector<1x32x256xf32> to vector<32x256xf32>
    %3 = arith.truncf %2 : vector<32x256xf32> to vector<32x256xbf16>
    %cst = arith.constant dense<0.000000e+00> : vector<8x32xf32>
    %4 = tpu.matmul %0, %3, %cst {dimension_numbers = #tpu.dot_dimension_numbers<[1], [1], [0], [0], [0, 0, 1, 0], [], []>} : vector<8x256xbf16>, vector<32x256xbf16>, vector<8x32xf32> -> vector<8x32xf32>
    %c0_4 = arith.constant 0 : index
    %c0_5 = arith.constant 0 : index
    %5 = vector.load %arg9[%c0_4, %c0_5] : memref<64x32xf32, #tpu.memory_space<vmem>>, vector<8x32xf32>
    tpu.vector_store %arg9[%c0_4, %c0_5], %4 {strides = array<i32>} : memref<64x32xf32, #tpu.memory_space<vmem>>, vector<8x32xf32>,
    %c1 = arith.constant 1 : index
    %c0_6 = arith.constant 0 : index
    %c0_7 = arith.constant 0 : index
    %6 = vector.load %arg1[%c1, %c0_6, %c0_7] : memref<8x32x256xf32, #tpu.memory_space<vmem>>, vector<1x32x256xf32>
    %7 = vector.shape_cast %6 : vector<1x32x256xf32> to vector<32x256xf32>
    %8 = arith.truncf %7 : vector<32x256xf32> to vector<32x256xbf16>
    %cst_8 = arith.constant dense<0.000000e+00> : vector<8x32xf32>
    %9 = tpu.matmul %0, %8, %cst_8 {dimension_numbers = #tpu.dot_dimension_numbers<[1], [1], [0], [0], [0, 0, 1, 0], [], []>} : vector<8x256xbf16>, vector<32x256xbf16>, vector<8x32xf32> -> vector<8x32xf32>
    %c8 = arith.constant 8 : index
    %c0_9 = arith.constant 0 : index
    %10 = vector.load %arg9[%c8, %c0_9] : memref<64x32xf32, #tpu.memory_space<vmem>>, vector<8x32xf32>
    tpu.vector_store %arg9[%c8, %c0_9], %9 {strides = array<i32>} : memref<64x32xf32, #tpu.memory_space<vmem>>, vector<8x32xf32>,
    %c2 = arith.constant 2 : index
    %c0_10 = arith.constant 0 : index
    %c0_11 = arith.constant 0 : index
    %11 = vector.load %arg1[%c2, %c0_10, %c0_11] : memref<8x32x256xf32, #tpu.memory_space<vmem>>, vector<1x32x256xf32>
    %12 = vector.shape_cast %11 : vector<1x32x256xf32> to vector<32x256xf32>
    %13 = arith.truncf %12 : vector<32x256xf32> to vector<32x256xbf16>
    %cst_12 = arith.constant dense<0.000000e+00> : vector<8x32xf32>
    %14 = tpu.matmul %0, %13, %cst_12 {dimension_numbers = #tpu.dot_dimension_numbers<[1], [1], [0], [0], [0, 0, 1, 0], [], []>} : vector<8x256xbf16>, vector<32x256xbf16>, vector<8x32xf32> -> vector<8x32xf32>
    %c16 = arith.constant 16 : index
    %c0_13 = arith.constant 0 : index
    %15 = vector.load %arg9[%c16, %c0_13] : memref<64x32xf32, #tpu.memory_space<vmem>>, vector<8x32xf32>
    tpu.vector_store %arg9[%c16, %c0_13], %14 {strides = array<i32>} : memref<64x32xf32, #tpu.memory_space<vmem>>, vector<8x32xf32>,
    %c3 = arith.constant 3 : index
    %c0_14 = arith.constant 0 : index
    %c0_15 = arith.constant 0 : index
    %16 = vector.load %arg1[%c3, %c0_14, %c0_15] : memref<8x32x256xf32, #tpu.memory_space<vmem>>, vector<1x32x256xf32>
    %17 = vector.shape_cast %16 : vector<1x32x256xf32> to vector<32x256xf32>
    %18 = arith.truncf %17 : vector<32x256xf32> to vector<32x256xbf16>
    %cst_16 = arith.constant dense<0.000000e+00> : vector<8x32xf32>
    %19 = tpu.matmul %0, %18, %cst_16 {dimension_numbers = #tpu.dot_dimension_numbers<[1], [1], [0], [0], [0, 0, 1, 0], [], []>} : vector<8x256xbf16>, vector<32x256xbf16>, vector<8x32xf32> -> vector<8x32xf32>
    %c24 = arith.constant 24 : index
    %c0_17 = arith.constant 0 : index
    %20 = vector.load %arg9[%c24, %c0_17] : memref<64x32xf32, #tpu.memory_space<vmem>>, vector<8x32xf32>
    tpu.vector_store %arg9[%c24, %c0_17], %19 {strides = array<i32>} : memref<64x32xf32, #tpu.memory_space<vmem>>, vector<8x32xf32>,
    %c4 = arith.constant 4 : index
    %c0_18 = arith.constant 0 : index
    %c0_19 = arith.constant 0 : index
    %21 = vector.load %arg1[%c4, %c0_18, %c0_19] : memref<8x32x256xf32, #tpu.memory_space<vmem>>, vector<1x32x256xf32>
    %22 = vector.shape_cast %21 : vector<1x32x256xf32> to vector<32x256xf32>
    %23 = arith.truncf %22 : vector<32x256xf32> to vector<32x256xbf16>
    %cst_20 = arith.constant dense<0.000000e+00> : vector<8x32xf32>
    %24 = tpu.matmul %0, %23, %cst_20 {dimension_numbers = #tpu.dot_dimension_numbers<[1], [1], [0], [0], [0, 0, 1, 0], [], []>} : vector<8x256xbf16>, vector<32x256xbf16>, vector<8x32xf32> -> vector<8x32xf32>
    %c32 = arith.constant 32 : index
    %c0_21 = arith.constant 0 : index
    %25 = vector.load %arg9[%c32, %c0_21] : memref<64x32xf32, #tpu.memory_space<vmem>>, vector<8x32xf32>
    tpu.vector_store %arg9[%c32, %c0_21], %24 {strides = array<i32>} : memref<64x32xf32, #tpu.memory_space<vmem>>, vector<8x32xf32>,
    %c5 = arith.constant 5 : index
    %c0_22 = arith.constant 0 : index
    %c0_23 = arith.constant 0 : index
    %26 = vector.load %arg1[%c5, %c0_22, %c0_23] : memref<8x32x256xf32, #tpu.memory_space<vmem>>, vector<1x32x256xf32>
    %27 = vector.shape_cast %26 : vector<1x32x256xf32> to vector<32x256xf32>
    %28 = arith.truncf %27 : vector<32x256xf32> to vector<32x256xbf16>
    %cst_24 = arith.constant dense<0.000000e+00> : vector<8x32xf32>
    %29 = tpu.matmul %0, %28, %cst_24 {dimension_numbers = #tpu.dot_dimension_numbers<[1], [1], [0], [0], [0, 0, 1, 0], [], []>} : vector<8x256xbf16>, vector<32x256xbf16>, vector<8x32xf32> -> vector<8x32xf32>
    %c40 = arith.constant 40 : index
    %c0_25 = arith.constant 0 : index
    %30 = vector.load %arg9[%c40, %c0_25] : memref<64x32xf32, #tpu.memory_space<vmem>>, vector<8x32xf32>
    tpu.vector_store %arg9[%c40, %c0_25], %29 {strides = array<i32>} : memref<64x32xf32, #tpu.memory_space<vmem>>, vector<8x32xf32>,
    %c6 = arith.constant 6 : index
    %c0_26 = arith.constant 0 : index
    %c0_27 = arith.constant 0 : index
    %31 = vector.load %arg1[%c6, %c0_26, %c0_27] : memref<8x32x256xf32, #tpu.memory_space<vmem>>, vector<1x32x256xf32>
    %32 = vector.shape_cast %31 : vector<1x32x256xf32> to vector<32x256xf32>
    %33 = arith.truncf %32 : vector<32x256xf32> to vector<32x256xbf16>
    %cst_28 = arith.constant dense<0.000000e+00> : vector<8x32xf32>
    %34 = tpu.matmul %0, %33, %cst_28 {dimension_numbers = #tpu.dot_dimension_numbers<[1], [1], [0], [0], [0, 0, 1, 0], [], []>} : vector<8x256xbf16>, vector<32x256xbf16>, vector<8x32xf32> -> vector<8x32xf32>
    %c48 = arith.constant 48 : index
    %c0_29 = arith.constant 0 : index
    %35 = vector.load %arg9[%c48, %c0_29] : memref<64x32xf32, #tpu.memory_space<vmem>>, vector<8x32xf32>
    tpu.vector_store %arg9[%c48, %c0_29], %34 {strides = array<i32>} : memref<64x32xf32, #tpu.memory_space<vmem>>, vector<8x32xf32>,
    %c7 = arith.constant 7 : index
    %c0_30 = arith.constant 0 : index
    %c0_31 = arith.constant 0 : index
    %36 = vector.load %arg1[%c7, %c0_30, %c0_31] : memref<8x32x256xf32, #tpu.memory_space<vmem>>, vector<1x32x256xf32>
    %37 = vector.shape_cast %36 : vector<1x32x256xf32> to vector<32x256xf32>
    %38 = arith.truncf %37 : vector<32x256xf32> to vector<32x256xbf16>
    %cst_32 = arith.constant dense<0.000000e+00> : vector<8x32xf32>
    %39 = tpu.matmul %0, %38, %cst_32 {dimension_numbers = #tpu.dot_dimension_numbers<[1], [1], [0], [0], [0, 0, 1, 0], [], []>} : vector<8x256xbf16>, vector<32x256xbf16>, vector<8x32xf32> -> vector<8x32xf32>
    %c56 = arith.constant 56 : index
    %c0_33 = arith.constant 0 : index
    %40 = vector.load %arg9[%c56, %c0_33] : memref<64x32xf32, #tpu.memory_space<vmem>>, vector<8x32xf32>
    tpu.vector_store %arg9[%c56, %c0_33], %39 {strides = array<i32>} : memref<64x32xf32, #tpu.memory_space<vmem>>, vector<8x32xf32>,
    %c0_34 = arith.constant 0 : index
    %c0_35 = arith.constant 0 : index
    %41 = vector.load %arg9[%c0_34, %c0_35] : memref<64x32xf32, #tpu.memory_space<vmem>>, vector<64x32xf32>
    %42 = arith.truncf %41 : vector<64x32xf32> to vector<64x32xbf16>
    %c0_36 = arith.constant 0 : index
    %c0_37 = arith.constant 0 : index
    %43 = vector.load %arg3[%c0_36, %c0_37] : memref<32x96xbf16, #tpu.memory_space<vmem>>, vector<32x96xbf16>
    %cst_38 = arith.constant dense<0.000000e+00> : vector<64x96xf32>
    %44 = tpu.matmul %42, %43, %cst_38 {dimension_numbers = #tpu.dot_dimension_numbers<[1], [0], [0], [1], [0, 0, 1, 1], [], []>} : vector<64x32xbf16>, vector<32x96xbf16>, vector<64x96xf32> -> vector<64x96xf32>
    %c0_39 = arith.constant 0 : index
    %c0_40 = arith.constant 0 : index
    %45 = vector.load %arg4[%c0_39, %c0_40] : memref<1x96xf32, #tpu.memory_space<vmem>>, vector<1x96xf32>
    %46 = vector.broadcast %45 : vector<1x96xf32> to vector<64x96xf32>
    %47 = arith.addf %44, %46 : vector<64x96xf32>
    %48 = vector.extract_strided_slice %47 {offsets = [0, 0], sizes = [64, 32], strides = [1, 1]} : vector<64x96xf32> to vector<64x32xf32>
    %49 = vector.extract_strided_slice %47 {offsets = [0, 32], sizes = [64, 32], strides = [1, 1]} : vector<64x96xf32> to vector<64x32xf32>
    %50 = vector.extract_strided_slice %47 {offsets = [0, 64], sizes = [64, 32], strides = [1, 1]} : vector<64x96xf32> to vector<64x32xf32>
    %cst_41 = arith.constant dense<0.000000e+00> : vector<64x64xf32>
    %51 = tpu.matmul %48, %49, %cst_41 {dimension_numbers = #tpu.dot_dimension_numbers<[1], [1], [0], [0], [0, 0, 1, 0], [], []>} : vector<64x32xf32>, vector<64x32xf32>, vector<64x64xf32> -> vector<64x64xf32>
    %c0_42 = arith.constant 0 : index
    %c0_43 = arith.constant 0 : index
    %52 = vector.load %arg5[%c0_42, %c0_43] : memref<64x64xf32, #tpu.memory_space<vmem>>, vector<64x64xf32>
    %53 = arith.addf %51, %52 : vector<64x64xf32>
    %cst_44 = arith.constant dense<0xFF800000> : vector<64xf32>
    %54 = vector.multi_reduction <maximumf>, %53, %cst_44 [1] : vector<64x64xf32> to vector<64xf32>
    %55 = vector.shape_cast %54 : vector<64xf32> to vector<64x1xf32>
    %56 = vector.broadcast %55 : vector<64x1xf32> to vector<64x64xf32>
    %57 = arith.subf %53, %56 : vector<64x64xf32>
    %58 = math.exp %57 : vector<64x64xf32>
    %cst_45 = arith.constant dense<0.000000e+00> : vector<64xf32>
    %59 = vector.multi_reduction <add>, %58, %cst_45 [1] : vector<64x64xf32> to vector<64xf32>
    %60 = vector.shape_cast %59 : vector<64xf32> to vector<64x1xf32>
    %61 = tpu.reciprocal %60 {approx = true} : vector<64x1xf32> -> vector<64x1xf32>
    %62 = vector.broadcast %61 : vector<64x1xf32> to vector<64x64xf32>
    %63 = arith.mulf %58, %62 : vector<64x64xf32>
    %c0_46 = arith.constant 0 : index
    %c0_47 = arith.constant 0 : index
    %64 = vector.load %arg6[%c0_46, %c0_47] : memref<8x64xf32, #tpu.memory_space<vmem>>, vector<8x64xf32>
    %cst_48 = arith.constant dense<0.000000e+00> : vector<8x64xf32>
    %65 = tpu.matmul %64, %63, %cst_48 {dimension_numbers = #tpu.dot_dimension_numbers<[1], [0], [0], [1], [0, 0, 1, 1], [], []>} : vector<8x64xf32>, vector<64x64xf32>, vector<8x64xf32> -> vector<8x64xf32>
    %cst_49 = arith.constant dense<0.000000e+00> : vector<8x32xf32>
    %66 = tpu.matmul %65, %50, %cst_49 {dimension_numbers = #tpu.dot_dimension_numbers<[1], [0], [0], [1], [0, 0, 1, 1], [], []>} : vector<8x64xf32>, vector<64x32xf32>, vector<8x32xf32> -> vector<8x32xf32>
    %c0_50 = arith.constant 0 : index
    %c0_51 = arith.constant 0 : index
    %67 = vector.load %arg7[%c0_50, %c0_51] : memref<8x32xf32, #tpu.memory_space<vmem>>, vector<8x32xf32>
    %68 = arith.addf %66, %67 : vector<8x32xf32>
    %c0_52 = arith.constant 0 : index
    %c0_53 = arith.constant 0 : index
    %69 = vector.load %arg8[%c0_52, %c0_53] : memref<8x32xf32, #tpu.memory_space<vmem>>, vector<8x32xf32>
    tpu.vector_store %arg8[%c0_52, %c0_53], %68 {strides = array<i32>} : memref<8x32xf32, #tpu.memory_space<vmem>>, vector<8x32xf32>,
    return
  }
  func.func @transform_0(%arg0: i32) -> (i32, i32, i32) {
    %c0_i32 = arith.constant 0 : i32
    %c0_i32_0 = arith.constant 0 : i32
    %c0_i32_1 = arith.constant 0 : i32
    return %arg0, %c0_i32, %c0_i32_0 : i32, i32, i32
  }
  func.func @transform_1(%arg0: i32) -> (i32, i32) {
    %c0_i32 = arith.constant 0 : i32
    %c0_i32_0 = arith.constant 0 : i32
    %c0_i32_1 = arith.constant 0 : i32
    return %c0_i32, %c0_i32_0 : i32, i32
  }
  func.func @transform_2(%arg0: i32) -> (i32, i32) {
    %c0_i32 = arith.constant 0 : i32
    %c0_i32_0 = arith.constant 0 : i32
    %c0_i32_1 = arith.constant 0 : i32
    return %c0_i32, %c0_i32_0 : i32, i32
  }
  func.func @transform_3(%arg0: i32) -> (i32, i32) {
    %c0_i32 = arith.constant 0 : i32
    %c0_i32_0 = arith.constant 0 : i32
    %c0_i32_1 = arith.constant 0 : i32
    return %c0_i32, %c0_i32_0 : i32, i32
  }
  func.func @transform_4(%arg0: i32) -> (i32, i32) {
    %c0_i32 = arith.constant 0 : i32
    %c0_i32_0 = arith.constant 0 : i32
    %c0_i32_1 = arith.constant 0 : i32
    return %c0_i32, %c0_i32_0 : i32, i32
  }
  func.func @transform_5(%arg0: i32) -> (i32, i32) {
    %c0_i32 = arith.constant 0 : i32
    %c0_i32_0 = arith.constant 0 : i32
    %c0_i32_1 = arith.constant 0 : i32
    return %c0_i32, %c0_i32_0 : i32, i32
  }
  func.func @transform_6(%arg0: i32) -> (i32, i32) {
    %c0_i32 = arith.constant 0 : i32
    %c0_i32_0 = arith.constant 0 : i32
    return %arg0, %c0_i32 : i32, i32
  }
  func.func @transform_7(%arg0: i32) -> (i32, i32) {
    %c0_i32 = arith.constant 0 : i32
    %c0_i32_0 = arith.constant 0 : i32
    return %arg0, %c0_i32 : i32, i32
  }
}

</mosaic_0001>

<bundles_post_ra>
// kernel: tpu_custom_call.1
= control target key start
LH: loop header
LB: loop body
LE: loop exit
PB: predicated region body
PF: predicated region fallthrough
CT: control target
= control target key end

     0   :  { %12 = vsyncpa [#allocation4], 0  ;;  %s1644_s0 = inlined_call_operand.hbm [shape: f32[8,32,256], index: 0, kind: input, shape index: {}]   ;;  %s1645_s1 = inlined_call_operand.hbm [shape: bf16[8,256], index: 1, kind: input, shape index: {}]   ;;  %s1646_s2 = inlined_call_operand.hbm [shape: bf16[32,96], index: 2, kind: input, shape index: {}]   ;;  %s1647_s3 = inlined_call_operand.vmem [shape: f32[1,96], index: 3, kind: input, shape index: {}]   ;;  %s1648_s4 = inlined_call_operand.hbm [shape: f32[64,64], index: 4, kind: input, shape index: {}]   ;;  %s1649_s5 = inlined_call_operand.vmem [shape: f32[8,64], index: 5, kind: input, shape index: {}]   ;;  %s1650_s6 = inlined_call_operand.hbm [shape: f32[8,32], index: 6, kind: input, shape index: {}]   ;;  %s1651_s7 = inlined_call_operand.hbm [shape: f32[8,32], index: 7, kind: output, shape index: {}]  }
   0x1   :  { %13 = vsyncpa [#allocation7], 0 }
   0x2   :  { %14 = vsyncpa [#allocation10], 0 }
   0x3   :  { %15 = vsyncpa [#allocation5], 0  ;;  %s1416_s24 = smov [#allocation6]   ;;  %s1417_s26 = smov [#allocation9]  }
   0x4   :  { %s34_s25 = sshll.u32 %s1416_s24, 4  ;;  %s57_s27 = sshll.u32 %s1417_s26, 4  ;;  %s35_s25 = int_to_ptr.vmem [resolvable:$true] %s34_s25  ;;  %s58_s27 = int_to_ptr.vmem [resolvable:$true] %s57_s27 }
   0x5   :  { %s1296_s28 = scalar_lea.vmem %s35_s25, 128  ;;  %p1301_p1 = scmp.lt.s32.totalorder %s35_s25, %s35_s25 }
   0x6   :  { %p1297_p0 = scmp.ne.s32.totalorder %s35_s25, %s1296_s28  ;;  %p1302_p2 = scmp.lt.s32.totalorder %s1296_s28, %s1296_s28 }
   0x8   :  { %p1303_p3 = por %p1302_p2, %p1301_p1 }
   0xa   :  { %p1304_p4 = pnand %p1303_p3, %p1297_p0 }
   0xc   :  { %1307 = shalt.err (!%p1304_p4)
}
   0xd   :  { %37 = dma.hbm_to_vmem [thread:$0]  %s1645_s1, 128, %s35_s25, [#allocation7]  }
   0xe   :  { %s1316_s8 = scalar_lea.vmem %s58_s27, 1024  ;;  %p1321_p6 = scmp.lt.s32.totalorder %s58_s27, %s58_s27 }
   0xf   :  { %p1317_p5 = scmp.ne.s32.totalorder %s58_s27, %s1316_s8  ;;  %p1322_p7 = scmp.lt.s32.totalorder %s1316_s8, %s1316_s8 }
  0x11   :  { %p1323_p8 = por %p1322_p7, %p1321_p6 }
  0x13   :  { %p1324_p9 = pnand %p1323_p8, %p1317_p5 }
  0x15   :  { %1327 = shalt.err (!%p1324_p9)
}
  0x16   :  { %s1418_s9 = smov 128   ;;  %s1419_s10 = smov 8  }
  0x17   :  { %63 = dma.hbm_to_vmem [thread:$0]  %s1648_s4, 1024, %s58_s27, [#allocation10], %s1418_s9, %s1418_s9, %s1419_s10  }
  0x18   :  { %s1420_s13 = smov [#allocation3]  }
  0x19   :  { %s21_s14 = sshll.u32 %s1420_s13, 4  ;;  %s22_s14 = int_to_ptr.vmem [resolvable:$true] %s21_s14 }
  0x1a   :  { %s1336_s15 = scalar_lea.vmem %s22_s14, 8192  ;;  %p1341_p11 = scmp.lt.s32.totalorder %s22_s14, %s22_s14 }
  0x1b   :  { %p1337_p10 = scmp.ne.s32.totalorder %s22_s14, %s1336_s15  ;;  %p1342_p12 = scmp.lt.s32.totalorder %s1336_s15, %s1336_s15 }
  0x1d   :  { %p1343_p13 = por %p1342_p12, %p1341_p11 }
  0x1f   :  { %p1344_p0 = pnand %p1343_p13, %p1337_p10 }
  0x21   :  { %1347 = shalt.err (!%p1344_p0)
}
  0x22   :  { %s1421_s1 = smov 256   ;;  %s1422_s16 = smov 16  }
  0x23   :  { %27 = dma.hbm_to_vmem [thread:$0]  %s1644_s0, 8192, %s22_s14, [#allocation4], %s1421_s1, %s1421_s1, %s1422_s16  }
  0x24   :  { %s1423_s19 = smov [#allocation8]  }
  0x25   :  { %s43_s20 = sshll.u32 %s1423_s19, 4  ;;  %s44_s20 = int_to_ptr.vmem [resolvable:$true] %s43_s20 }
  0x26   :  { %s1356_s4 = scalar_lea.vmem %s44_s20, 256  ;;  %p1361_p2 = scmp.lt.s32.totalorder %s44_s20, %s44_s20 }
  0x27   :  { %p1357_p1 = scmp.ne.s32.totalorder %s44_s20, %s1356_s4  ;;  %p1362_p3 = scmp.lt.s32.totalorder %s1356_s4, %s1356_s4 }
  0x29   :  { %p1363_p4 = por %p1362_p3, %p1361_p2 }
  0x2b   :  { %p1364_p5 = pnand %p1363_p4, %p1357_p1 }
  0x2d   :  { %1367 = shalt.err (!%p1364_p5)
}
  0x2e   :  { %s1424_s21 = smov 64   ;;  %s1425_s22 = smov 4  }
  0x2f   :  { %49 = dma.hbm_to_vmem [thread:$0]  %s1646_s2, 256, %s44_s20, [#allocation7], %s1424_s21, %s1424_s21, %s1425_s22  }
  0x30   :  { %s1426_s25 = smov [#allocation11]  }
  0x31   :  { %s72_s0 = sshll.u32 %s1426_s25, 4  ;;  %s73_s0 = int_to_ptr.vmem [resolvable:$true] %s72_s0 }
  0x32   :  { %s1376_s26 = scalar_lea.vmem %s73_s0, 128  ;;  %p1381_p7 = scmp.lt.s32.totalorder %s73_s0, %s73_s0 }
  0x33   :  { %p1377_p6 = scmp.ne.s32.totalorder %s73_s0, %s1376_s26  ;;  %p1382_p8 = scmp.lt.s32.totalorder %s1376_s26, %s1376_s26 }
  0x35   :  { %p1383_p9 = por %p1382_p8, %p1381_p7 }
  0x37   :  { %p1384_p10 = pnand %p1383_p9, %p1377_p6 }
  0x39   :  { %1387 = shalt.err (!%p1384_p10)
}
  0x3a   :  { %75 = dma.hbm_to_vmem [thread:$0]  %s1650_s6, 128, %s73_s0, [#allocation10]  }
  0x3b   :  { %1408 = dma.done.wait [#allocation4], 8192  }
  0x3c   :  { %1409 = vsyncadd [#allocation4], 4294959104 }
  0x3d   :  { %1410 = dma.done.wait [#allocation7], 384  }
  0x3e   :  { %1411 = vsyncadd [#allocation7], 4294966912 }
  0x3f   :  { %1412 = dma.done.wait [#allocation10], 1152  }
  0x40   :  { %1413 = vsyncadd [#allocation10], 4294966144  ;;  %v98_v0 = vld [vmem:[#allocation3 + $0x28] sm:$0xff]  ;;  %v100_v1 = vld [vmem:[#allocation3 + $0x38] sm:$0xff]  ;;  %vm152_vm0 = vcmask 261120   ;;  %s1427_s29 = smov 96  }
  0x41   :  { %v160_v2 = vld [vmem:[#allocation3 + $0x68] sm:$0xff]  ;;  %v104_v3 = vpack.c.bf16 %v100_v1, %v98_v0  ;;  %v162_v4 = vld [vmem:[#allocation3 + $0x78] sm:$0xff]  ;;  %v97_v5 = vld [vmem:[#allocation3 + $0x20] sm:$0xff]  ;;  %vm813_vm1 = vcmask 523264   ;;  %vm1429_vm2 = vmmov 0  }
  0x42   :  { %v99_v6 = vld [vmem:[#allocation3 + $0x30] sm:$0xff]  ;;  %v166_v7 = vpack.c.bf16 %v162_v4, %v160_v2  ;;  %v159_v9 = vld [vmem:[#allocation3 + $0x60] sm:$0xff]  ;;  %v94_v11 = vld [vmem:[#allocation3 + $0x8] sm:$0xff] }
  0x43   :  { %v103_v8 = vpack.c.bf16 %v99_v6, %v97_v5  ;;  %v161_v10 = vld [vmem:[#allocation3 + $0x70] sm:$0xff]  ;;  %124 = vmatprep.subr.bf16.mxu0 %v104_v3  ;;  %v96_v13 = vld [vmem:[#allocation3 + $0x18] sm:$0xff]  ;;  %v156_v14 = vld [vmem:[#allocation3 + $0x48] sm:$0xff] }
  0x44   :  { %v165_v12 = vpack.c.bf16 %v161_v10, %v159_v9  ;;  %v158_v15 = vld [vmem:[#allocation3 + $0x58] sm:$0xff]  ;;  %179 = vmatprep.subr.bf16.mxu1 %v166_v7  ;;  %v102_v16 = vpack.c.bf16 %v96_v13, %v94_v11  ;;  %v93_v18 = vld [vmem:[#allocation3] sm:$0xff]  ;;  %v95_v19 = vld [vmem:[#allocation3 + $0x10] sm:$0xff] }
  0x45   :  { %125 = vmatpush1.bf16.xpose.msra.mxu0 %v103_v8  ;;  %v164_v17 = vpack.c.bf16 %v158_v15, %v156_v14  ;;  %v155_v20 = vld [vmem:[#allocation3 + $0x40] sm:$0xff]  ;;  %v157_v22 = vld [vmem:[#allocation3 + $0x50] sm:$0xff]  ;;  %v214_v24 = vld [vmem:[#allocation3 + $0xa8] sm:$0xff]  ;;  %v101_v28 = vpack.c.bf16 %v95_v19, %v93_v18 }
  0x46   :  { %180 = vmatpush1.bf16.xpose.msra.mxu1 %v165_v12  ;;  %v92_v21 = vld [vmem:[#allocation6] sm:$0xff]  ;;  %126 = vmatprep.subr.bf16.mxu0 %v102_v16  ;;  %v216_v25 = vld [vmem:[#allocation3 + $0xb8] sm:$0xff]  ;;  %v268_v26 = vld [vmem:[#allocation3 + $0xe8] sm:$0xff]  ;;  %v163_v29 = vpack.c.bf16 %v157_v22, %v155_v20 }
  0x47   :  { %181 = vmatprep.subr.bf16.mxu1 %v164_v17  ;;  %v1488_v23 = vcombine.high %v92_v21, %v92_v21  ;;  %v270_v27 = vld [vmem:[#allocation3 + $0xf8] sm:$0xff]  ;;  %v220_v30 = vpack.c.bf16 %v216_v25, %v214_v24  ;;  %v213_v32 = vld [vmem:[#allocation3 + $0xa0] sm:$0xff]  ;;  %v215_v33 = vld [vmem:[#allocation3 + $0xb0] sm:$0xff]  ;;  %v1492_v38 = vcombine.low %v92_v21, %v92_v21 }
  0x48   :  { %v274_v31 = vpack.c.bf16 %v270_v27, %v268_v26  ;;  %v267_v34 = vld [vmem:[#allocation3 + $0xe0] sm:$0xff]  ;;  %v269_v35 = vld [vmem:[#allocation3 + $0xf0] sm:$0xff]  ;;  %v210_v36 = vld [vmem:[#allocation3 + $0x88] sm:$0xff]  ;;  %v219_v41 = vpack.c.bf16 %v215_v33, %v213_v32 }
  0x49   :  { %144 = vmatprep.mubr.bf16.mxu0 %v1488_v23  ;;  %199 = vmatprep.mubr.bf16.mxu1 %v1488_v23  ;;  %v212_v37 = vld [vmem:[#allocation3 + $0x98] sm:$0xff]  ;;  %v264_v39 = vld [vmem:[#allocation3 + $0xc8] sm:$0xff]  ;;  %v273_v42 = vpack.c.bf16 %v269_v35, %v267_v34  ;;  %v209_v45 = vld [vmem:[#allocation3 + $0x80] sm:$0xff] }
  0x4a   :  { %v266_v40 = vld [vmem:[#allocation3 + $0xd8] sm:$0xff]  ;;  %v218_v43 = vpack.c.bf16 %v212_v37, %v210_v36  ;;  %v211_v46 = vld [vmem:[#allocation3 + $0x90] sm:$0xff]  ;;  %v263_v47 = vld [vmem:[#allocation3 + $0xc0] sm:$0xff] }
  0x4b   :  { %v272_v44 = vpack.c.bf16 %v266_v40, %v264_v39  ;;  %v265_v48 = vld [vmem:[#allocation3 + $0xd0] sm:$0xff]  ;;  %v322_v49 = vld [vmem:[#allocation3 + $0x128] sm:$0xff]  ;;  %v324_v50 = vld [vmem:[#allocation3 + $0x138] sm:$0xff]  ;;  %v217_v53 = vpack.c.bf16 %v211_v46, %v209_v45 }
  0x4c   :  { %v376_v51 = vld [vmem:[#allocation3 + $0x168] sm:$0xff]  ;;  %v378_v52 = vld [vmem:[#allocation3 + $0x178] sm:$0xff]  ;;  %v271_v54 = vpack.c.bf16 %v265_v48, %v263_v47  ;;  %v328_v55 = vpack.c.bf16 %v324_v50, %v322_v49  ;;  %v321_v57 = vld [vmem:[#allocation3 + $0x120] sm:$0xff] }
  0x4d   :  { %127 = vmatpush1.bf16.xpose.msra.mxu0 %v101_v28  ;;  %v382_v56 = vpack.c.bf16 %v378_v52, %v376_v51  ;;  %v323_v58 = vld [vmem:[#allocation3 + $0x130] sm:$0xff]  ;;  %v375_v59 = vld [vmem:[#allocation3 + $0x160] sm:$0xff]  ;;  %v318_v61 = vld [vmem:[#allocation3 + $0x108] sm:$0xff] }
  0x4e   :  { %182 = vmatpush1.bf16.xpose.msra.mxu1 %v163_v29  ;;  %233 = vmatprep.subr.bf16.mxu0 %v220_v30  ;;  %v377_v60 = vld [vmem:[#allocation3 + $0x170] sm:$0xff]  ;;  %v320_v62 = vld [vmem:[#allocation3 + $0x118] sm:$0xff]  ;;  %v372_v63 = vld [vmem:[#allocation3 + $0x148] sm:$0xff]  ;;  %v327_v1 = vpack.c.bf16 %v323_v58, %v321_v57 }
  0x4f   :  { %287 = vmatprep.subr.bf16.mxu1 %v274_v31  ;;  %v374_v0 = vld [vmem:[#allocation3 + $0x158] sm:$0xff]  ;;  %v381_v2 = vpack.c.bf16 %v377_v60, %v375_v59  ;;  %v326_v3 = vpack.c.bf16 %v320_v62, %v318_v61  ;;  %v317_v5 = vld [vmem:[#allocation3 + $0x100] sm:$0xff]  ;;  %v319_v6 = vld [vmem:[#allocation3 + $0x110] sm:$0xff] }
  0x50   :  { %v380_v4 = vpack.c.bf16 %v374_v0, %v372_v63  ;;  %v371_v7 = vld [vmem:[#allocation3 + $0x140] sm:$0xff]  ;;  %v373_v8 = vld [vmem:[#allocation3 + $0x150] sm:$0xff]  ;;  %v430_v9 = vld [vmem:[#allocation3 + $0x1a8] sm:$0xff]  ;;  %v325_v13 = vpack.c.bf16 %v319_v6, %v317_v5 }
  0x51   :  { %v432_v10 = vld [vmem:[#allocation3 + $0x1b8] sm:$0xff]  ;;  %v484_v11 = vld [vmem:[#allocation3 + $0x1e8] sm:$0xff]  ;;  %v379_v14 = vpack.c.bf16 %v373_v8, %v371_v7  ;;  %v429_v17 = vld [vmem:[#allocation3 + $0x1a0] sm:$0xff] }
  0x52   :  { %v486_v12 = vld [vmem:[#allocation3 + $0x1f8] sm:$0xff]  ;;  %v436_v15 = vpack.c.bf16 %v432_v10, %v430_v9  ;;  %v431_v18 = vld [vmem:[#allocation3 + $0x1b0] sm:$0xff]  ;;  %v483_v19 = vld [vmem:[#allocation3 + $0x1e0] sm:$0xff] }
  0x53   :  { %v490_v16 = vpack.c.bf16 %v486_v12, %v484_v11  ;;  %v485_v20 = vld [vmem:[#allocation3 + $0x1f0] sm:$0xff]  ;;  %v426_v21 = vld [vmem:[#allocation3 + $0x188] sm:$0xff]  ;;  %v428_v22 = vld [vmem:[#allocation3 + $0x198] sm:$0xff]  ;;  %v435_v26 = vpack.c.bf16 %v431_v18, %v429_v17 }
  0x54   :  { %145 = vmatmul.mubr.bf16.vlgmr.msra.gmra.mxu0 %v1492_v38  ;;  %v480_v24 = vld [vmem:[#allocation3 + $0x1c8] sm:$0xff]  ;;  %v482_v25 = vld [vmem:[#allocation3 + $0x1d8] sm:$0xff]  ;;  %v489_v27 = vpack.c.bf16 %v485_v20, %v483_v19  ;;  %v434_v28 = vpack.c.bf16 %v428_v22, %v426_v21  ;;  %v425_v30 = vld [vmem:[#allocation3 + $0x180] sm:$0xff] }
  0x55   :  { %200 = vmatmul.mubr.bf16.vlgmr.msra.gmra.mxu1 %v1492_v38  ;;  %234 = vmatpush1.bf16.xpose.msra.mxu0 %v219_v41  ;;  %v488_v29 = vpack.c.bf16 %v482_v25, %v480_v24  ;;  %v427_v31 = vld [vmem:[#allocation3 + $0x190] sm:$0xff]  ;;  %v479_v32 = vld [vmem:[#allocation3 + $0x1c0] sm:$0xff]  ;;  %v1255_v37 = vld [vmem:[#allocation8] sm:$0xff]  }
  0x56   :  { %288 = vmatpush1.bf16.xpose.msra.mxu1 %v273_v42  ;;  %235 = vmatprep.subr.bf16.mxu0 %v218_v43  ;;  %v481_v33 = vld [vmem:[#allocation3 + $0x1d0] sm:$0xff]  ;;  %v433_v34 = vpack.c.bf16 %v427_v31, %v425_v30  ;;  %v1094_v18 = vld [vmem:[%s1647_s3] ss:$0 sm:$0xff] }
  0x57   :  { %289 = vmatprep.subr.bf16.mxu1 %v272_v44  ;;  %253 = vmatprep.mubr.bf16.mxu0 %v1488_v23  ;;  %v487_v35 = vpack.c.bf16 %v481_v33, %v479_v32  ;;  %v1254_v36 = vld [vmem:[#allocation8 + $0x8] sm:$0xff]  }
  0x58   :  { %307 = vmatprep.mubr.bf16.mxu1 %v1488_v23 }
  0x5d   :  { %236 = vmatpush1.bf16.xpose.msra.mxu0 %v217_v53 }
  0x5e   :  { %290 = vmatpush1.bf16.xpose.msra.mxu1 %v271_v54  ;;  %341 = vmatprep.subr.bf16.mxu0 %v328_v55 }
  0x5f   :  { %395 = vmatprep.subr.bf16.mxu1 %v382_v56 }
  0x64   :  { %254 = vmatmul.mubr.bf16.vlgmr.msra.gmra.mxu0 %v1492_v38 }
  0x65   :  { %308 = vmatmul.mubr.bf16.vlgmr.msra.gmra.mxu1 %v1492_v38  ;;  %342 = vmatpush1.bf16.xpose.msra.mxu0 %v327_v1 }
  0x66   :  { %396 = vmatpush1.bf16.xpose.msra.mxu1 %v381_v2  ;;  %343 = vmatprep.subr.bf16.mxu0 %v326_v3 }
  0x67   :  { %397 = vmatprep.subr.bf16.mxu1 %v380_v4  ;;  %361 = vmatprep.mubr.bf16.mxu0 %v1488_v23 }
  0x68   :  { %415 = vmatprep.mubr.bf16.mxu1 %v1488_v23 }
  0x6d   :  { %344 = vmatpush1.bf16.xpose.msra.mxu0 %v325_v13 }
  0x6e   :  { %398 = vmatpush1.bf16.xpose.msra.mxu1 %v379_v14  ;;  %449 = vmatprep.subr.bf16.mxu0 %v436_v15 }
  0x6f   :  { %503 = vmatprep.subr.bf16.mxu1 %v490_v16 }
  0x74   :  { %362 = vmatmul.mubr.bf16.vlgmr.msra.gmra.mxu0 %v1492_v38 }
  0x75   :  { %416 = vmatmul.mubr.bf16.vlgmr.msra.gmra.mxu1 %v1492_v38  ;;  %450 = vmatpush1.bf16.xpose.msra.mxu0 %v435_v26 }
  0x76   :  { %504 = vmatpush1.bf16.xpose.msra.mxu1 %v489_v27  ;;  %451 = vmatprep.subr.bf16.mxu0 %v434_v28 }
  0x77   :  { %505 = vmatprep.subr.bf16.mxu1 %v488_v29  ;;  %469 = vmatprep.mubr.bf16.mxu0 %v1488_v23 }
  0x78   :  { %523 = vmatprep.mubr.bf16.mxu1 %v1488_v23 }
  0x7d   :  { %452 = vmatpush1.bf16.xpose.msra.mxu0 %v433_v34 }
  0x7e   :  { %506 = vmatpush1.bf16.xpose.msra.mxu1 %v487_v35  ;;  %1159 = vmatprep.subr.bf16.mxu0 %v1254_v36 }
  0x84   :  { %470 = vmatmul.mubr.bf16.vlgmr.msra.gmra.mxu0 %v1492_v38 }
  0x85   :  { %524 = vmatmul.mubr.bf16.vlgmr.msra.gmra.mxu1 %v1492_v38  ;;  %1160 = vmatpush3.bf16.msra.mxu0 %v1254_v36 }
  0x86   :  { %1161 = vmatprep.subr.bf16.mxu0 %v1255_v37 }
  0x89   :  { %1162 = vmatpush3.bf16.msra.mxu0 %v1255_v37 }
 0x114   :  { %v146_v39 = vpop.f32.mrf.mxu0 }
 0x115   :  { %153 = vst.msk [vmem:[#allocation2] sm:$0xff] %vm152_vm0, %v146_v39  ;;  %v201_v40 = vpop.f32.mrf.mxu1 }
 0x116   :  { %207 = vst.msk [vmem:[#allocation2 + $0x8] sm:$0xff] %vm152_vm0, %v201_v40  ;;  %v148_v23 = vpop.f32.mrf.mxu0 }
 0x117   :  { %v203_v41 = vpop.f32.mrf.mxu1 }
 0x118   :  { %v149_v42 = vpop.f32.mrf.mxu0 }
 0x119   :  { %v204_v43 = vpop.f32.mrf.mxu1 }
 0x11a   :  { %v150_v44 = vpop.f32.mrf.mxu0 }
 0x11b   :  { %v205_v45 = vpop.f32.mrf.mxu1 }
 0x11c   :  { %v532_v38 = vld [vmem:[#allocation2] sm:$0xff] }
 0x11d   :  { %v533_v46 = vld [vmem:[#allocation2 + $0x8] sm:$0xff] }
 0x11e   :  { %v540_v47 = vpack.c.bf16 %v533_v46, %v532_v38 }
 0x120   :  { %1163 = vmatprep.mubr.msk.bf16.mxu0 %vm152_vm0, %v540_v47 }
 0x124   :  { %v255_v48 = vpop.f32.mrf.mxu0 }
 0x125   :  { %261 = vst.msk [vmem:[#allocation2 + $0x10] sm:$0xff] %vm152_vm0, %v255_v48  ;;  %v309_v49 = vpop.f32.mrf.mxu1  ;;  %v651_v48 = vld [vmem:[#allocation9 + $0x38] sm:$0xff] }
 0x126   :  { %315 = vst.msk [vmem:[#allocation2 + $0x18] sm:$0xff] %vm152_vm0, %v309_v49  ;;  %v257_v50 = vpop.f32.mrf.mxu0  ;;  %v649_v49 = vld [vmem:[#allocation9 + $0x28] sm:$0xff] }
 0x127   :  { %v311_v51 = vpop.f32.mrf.mxu1 }
 0x128   :  { %v258_v52 = vpop.f32.mrf.mxu0  ;;  %v650_v51 = vld [vmem:[#allocation9 + $0x30] sm:$0xff] }
 0x129   :  { %v312_v53 = vpop.f32.mrf.mxu1 }
 0x12a   :  { %v259_v54 = vpop.f32.mrf.mxu0  ;;  %v647_v53 = vld [vmem:[#allocation9 + $0x18] sm:$0xff] }
 0x12b   :  { %v313_v55 = vpop.f32.mrf.mxu1 }
 0x12c   :  { %v534_v56 = vld [vmem:[#allocation2 + $0x10] sm:$0xff] }
 0x12d   :  { %v535_v57 = vld [vmem:[#allocation2 + $0x18] sm:$0xff] }
 0x12e   :  { %v541_v58 = vpack.c.bf16 %v535_v57, %v534_v56 }
 0x130   :  { %1164 = vmatmul.mubr.msk.bf16.vlgmr.msra.gmra.mxu0 %vm152_vm0, %v541_v58  ;;  %v648_v58 = vld [vmem:[#allocation9 + $0x20] sm:$0xff] }
 0x134   :  { %v363_v59 = vpop.f32.mrf.mxu0 }
 0x135   :  { %369 = vst.msk [vmem:[#allocation2 + $0x20] sm:$0xff] %vm152_vm0, %v363_v59  ;;  %v417_v60 = vpop.f32.mrf.mxu1 }
 0x136   :  { %423 = vst.msk [vmem:[#allocation2 + $0x28] sm:$0xff] %vm152_vm0, %v417_v60  ;;  %v365_v61 = vpop.f32.mrf.mxu0 }
 0x137   :  { %v419_v62 = vpop.f32.mrf.mxu1  ;;  %v645_v61 = vld [vmem:[#allocation9 + $0x8] sm:$0xff] }
 0x138   :  { %v366_v63 = vpop.f32.mrf.mxu0 }
 0x139   :  { %v420_v0 = vpop.f32.mrf.mxu1 }
 0x13a   :  { %v367_v1 = vpop.f32.mrf.mxu0  ;;  %v646_v0 = vld [vmem:[#allocation9 + $0x10] sm:$0xff] }
 0x13b   :  { %v421_v2 = vpop.f32.mrf.mxu1 }
 0x13c   :  { %v536_v3 = vld [vmem:[#allocation2 + $0x20] sm:$0xff] }
 0x13d   :  { %v537_v4 = vld [vmem:[#allocation2 + $0x28] sm:$0xff] }
 0x13e   :  { %v542_v5 = vpack.c.bf16 %v537_v4, %v536_v3 }
 0x140   :  { %1167 = vmatprep.mubr.msk.bf16.mxu0 %vm152_vm0, %v542_v5  ;;  %v644_v5 = vld [vmem:[#allocation9] sm:$0xff] }
 0x144   :  { %v471_v6 = vpop.f32.mrf.mxu0 }
 0x145   :  { %477 = vst.msk [vmem:[#allocation2 + $0x30] sm:$0xff] %vm152_vm0, %v471_v6  ;;  %v525_v7 = vpop.f32.mrf.mxu1 }
 0x146   :  { %531 = vst.msk [vmem:[#allocation2 + $0x38] sm:$0xff] %vm152_vm0, %v525_v7  ;;  %v473_v8 = vpop.f32.mrf.mxu0 }
 0x147   :  { %v527_v9 = vpop.f32.mrf.mxu1 }
 0x148   :  { %v474_v10 = vpop.f32.mrf.mxu0 }
 0x149   :  { %v528_v11 = vpop.f32.mrf.mxu1 }
 0x14a   :  { %v475_v12 = vpop.f32.mrf.mxu0 }
 0x14b   :  { %v529_v13 = vpop.f32.mrf.mxu1 }
 0x14c   :  { %v538_v14 = vld [vmem:[#allocation2 + $0x30] sm:$0xff] }
 0x14d   :  { %v539_v15 = vld [vmem:[#allocation2 + $0x38] sm:$0xff] }
 0x14e   :  { %v543_v16 = vpack.c.bf16 %v539_v15, %v538_v14 }
 0x150   :  { %1168 = vmatmul.mubr.msk.bf16.gmra.mxu0 %vm152_vm0, %v543_v16 }
 0x1f0   :  { %v1165_v17 = vpop.f32.mrf.mxu0 }
 0x1f1   :  { %v1541_v33 = vadd.f32 %v1165_v17, %v1094_v18 }
 0x1f2   :  { %v613_v19 = vpop.f32.mrf.mxu0 }
 0x1f3   :  { %v1523_v20 = vadd.f32 %v1094_v18, %v613_v19 }
 0x1f4   :  { %v1166_v21 = vpop.f32.mrf.mxu0 }
 0x1f5   :  { %1187 = vmatprep.mubr.msk.f32.mxu1 %vm152_vm0, %v1523_v20  ;;  %v1538_v32 = vadd.f32 %v1166_v21, %v1094_v18 }
 0x1f6   :  { %v616_v22 = vpop.f32.mrf.mxu0 }
 0x1f7   :  { %v1544_v34 = vadd.f32 %v1094_v18, %v616_v22 }
 0x210   :  { %v1169_v24 = vpop.f32.mrf.mxu0 }
 0x211   :  { %v1532_v30 = vadd.f32 %v1169_v24, %v1094_v18 }
 0x212   :  { %v629_v25 = vpop.f32.mrf.mxu0 }
 0x213   :  { %v1535_v31 = vadd.f32 %v1094_v18, %v629_v25 }
 0x214   :  { %v1170_v26 = vpop.f32.mrf.mxu0 }
 0x215   :  { %v1527_v27 = vadd.f32 %v1170_v26, %v1094_v18 }
 0x216   :  { %v632_v28 = vpop.f32.mrf.mxu0 }
 0x217   :  { %v1529_v29 = vadd.f32 %v1094_v18, %v632_v28  ;;  %674 = vrot.lane.b32.xlu0 %v1527_v27, %s1427_s29 }
 0x219   :  { %670 = vrot.lane.b32.xlu1 %v1529_v29, %s1427_s29 }
 0x21b   :  { %672 = vrot.lane.b32.xlu0 %v1532_v30, %s1427_s29 }
 0x21d   :  { %668 = vrot.lane.b32.xlu1 %v1535_v31, %s1427_s29 }
 0x21f   :  { %666 = vrot.lane.b32.xlu0 %v1538_v32, %s1427_s29 }
 0x221   :  { %664 = vrot.lane.b32.xlu1 %v1541_v33, %s1427_s29 }
 0x223   :  { %662 = vrot.lane.b32.xlu0 %v1544_v34, %s1427_s29 }
 0x225   :  { %660 = vrot.lane.b32.xlu1 %v1523_v20, %s1427_s29 }
 0x289   :  { %v675_v35 = vpop.permute.xlu0 %674 }
 0x28a   :  { %1171 = vmatprep.subr.msk.mxu1 %vm152_vm0, %v675_v35 }
 0x28b   :  { %1172 = vmatpush3.xpose.msk.msra.mxu1 %vm152_vm0, %v675_v35  ;;  %v671_v36 = vpop.permute.xlu1 %670 }
 0x28d   :  { %v673_v37 = vpop.permute.xlu0 %672 }
 0x28e   :  { %1173 = vmatprep.subr.msk.mxu1 %vm152_vm0, %v673_v37 }
 0x28f   :  { %1174 = vmatpush3.xpose.msk.msra.mxu1 %vm152_vm0, %v673_v37  ;;  %v669_v39 = vpop.permute.xlu1 %668 }
 0x290   :  { %1175 = vmatprep.subr.msk.mxu1 %vm152_vm0, %v671_v36 }
 0x291   :  { %v667_v40 = vpop.permute.xlu0 %666 }
 0x293   :  { %1176 = vmatpush3.xpose.msk.msra.mxu1 %vm152_vm0, %v671_v36  ;;  %v665_v23 = vpop.permute.xlu1 %664 }
 0x294   :  { %1177 = vmatprep.subr.msk.mxu1 %vm152_vm0, %v669_v39 }
 0x295   :  { %v663_v41 = vpop.permute.xlu0 %662 }
 0x297   :  { %1178 = vmatpush3.xpose.msk.msra.mxu1 %vm152_vm0, %v669_v39  ;;  %v661_v42 = vpop.permute.xlu1 %660 }
 0x298   :  { %1179 = vmatprep.subr.msk.mxu1 %vm152_vm0, %v667_v40 }
 0x29b   :  { %1180 = vmatpush3.xpose.msk.msra.mxu1 %vm152_vm0, %v667_v40 }
 0x29c   :  { %1181 = vmatprep.subr.msk.mxu1 %vm152_vm0, %v665_v23 }
 0x29f   :  { %1182 = vmatpush3.xpose.msk.msra.mxu1 %vm152_vm0, %v665_v23 }
 0x2a0   :  { %1183 = vmatprep.subr.msk.mxu1 %vm152_vm0, %v663_v41 }
 0x2a3   :  { %1184 = vmatpush3.xpose.msk.msra.mxu1 %vm152_vm0, %v663_v41 }
 0x2a4   :  { %1185 = vmatprep.subr.msk.mxu1 %vm152_vm0, %v661_v42 }
 0x2a7   :  { %1186 = vmatpush3.xpose.msk.msra.mxu1 %vm152_vm0, %v661_v42 }
 0x2aa   :  { %1188 = vmatmul.mubr.msk.f32.vlgmr.msra.gmra.mxu1 %vm152_vm0, %v1544_v34 }
 0x2ab   :  { %1190 = vmatprep.mubr.msk.f32.mxu1 %vm152_vm0, %v1541_v33 }
 0x2ae   :  { %1191 = vmatmul.mubr.msk.f32.gmra.mxu1 %vm152_vm0, %v1538_v32 }
 0x2af   :  { %1193 = vmatprep.mubr.msk.f32.mxu1 %vm152_vm0, %v1535_v31 }
 0x2b2   :  { %1194 = vmatmul.mubr.msk.f32.gmra.mxu1 %vm152_vm0, %v1529_v29 }
 0x2b3   :  { %1196 = vmatprep.mubr.msk.f32.mxu1 %vm152_vm0, %v1532_v30 }
 0x2b6   :  { %1197 = vmatmul.mubr.msk.f32.gmra.mxu1 %vm152_vm0, %v1527_v27 }
 0x36a   :  { %v1189_v43 = vpop.f32.mrf.mxu1 }
 0x36b   :  { %v780_v1 = vadd.f32 %v1189_v43, %v645_v61 }
 0x36c   :  { %v774_v44 = vpop.f32.mrf.mxu1 }
 0x36d   :  { %v817_v6 = vsel %vm813_vm1, %v780_v1, -inf  ;;  %v775_v7 = vadd.f32 %v774_v44, %v644_v5 }
 0x36e   :  { %v1192_v45 = vpop.f32.mrf.mxu1 }
 0x36f   :  { %v790_v59 = vadd.f32 %v1192_v45, %v647_v53  ;;  %v814_v9 = vsel %vm813_vm1, %v775_v7, -inf }
 0x370   :  { %v784_v38 = vpop.f32.mrf.mxu1 }
 0x371   :  { %v823_v2 = vsel %vm813_vm1, %v790_v59, -inf  ;;  %v785_v3 = vadd.f32 %v784_v38, %v646_v0 }
 0x372   :  { %v1195_v46 = vpop.f32.mrf.mxu1 }
 0x373   :  { %v800_v55 = vadd.f32 %v1195_v46, %v649_v49  ;;  %v820_v8 = vsel %vm813_vm1, %v785_v3, -inf }
 0x374   :  { %v794_v47 = vpop.f32.mrf.mxu1 }
 0x375   :  { %v795_v62 = vadd.f32 %v794_v47, %v648_v58  ;;  %v829_v63 = vsel %vm813_vm1, %v800_v55, -inf  ;;  %v1428_v58 = vmov 0.0  }
 0x376   :  { %v1198_v50 = vpop.f32.mrf.mxu1  ;;  %1199 = vmatprep.subr.mxu0 %v1428_v58  ;;  %1215 = vmatprep.mubr.msk.f32.mxu0 %vm1429_vm2, %v1428_v58 }
 0x377   :  { %v810_v52 = vadd.f32 %v1198_v50, %v651_v48  ;;  %v826_v4 = vsel %vm813_vm1, %v795_v62, -inf }
 0x378   :  { %v804_v54 = vpop.f32.mrf.mxu1 }
 0x379   :  { %v805_v56 = vadd.f32 %v804_v54, %v650_v51  ;;  %v835_v57 = vsel %vm813_vm1, %v810_v52, -inf }
 0x37a   :  { %836 = vmax.xlane.f32.xlu0 %v835_v57 }
 0x37b   :  { %v832_v60 = vsel %vm813_vm1, %v805_v56, -inf }
 0x37c   :  { %833 = vmax.xlane.f32.xlu1 %v832_v60 }
 0x37e   :  { %830 = vmax.xlane.f32.xlu0 %v829_v63 }
 0x380   :  { %824 = vmax.xlane.f32.xlu1 %v823_v2 }
 0x382   :  { %827 = vmax.xlane.f32.xlu0 %v826_v4 }
 0x384   :  { %818 = vmax.xlane.f32.xlu1 %v817_v6 }
 0x386   :  { %821 = vmax.xlane.f32.xlu0 %v820_v8 }
 0x38a   :  { %815 = vmax.xlane.f32.xlu0 %v814_v9 }
 0x403   :  { %v837_v10 = vpop.xlane.xlu0 %836 }
 0x404   :  { %v845_v11 = vsub.f32 %v810_v52, %v837_v10 }
 0x405   :  { %v834_v12 = vpop.xlane.xlu1 %833 }
 0x406   :  { %v860_v13 = vmul.f32 1.442695, %v845_v11  ;;  %v844_v14 = vsub.f32 %v805_v56, %v834_v12 }
 0x407   :  { %v831_v15 = vpop.xlane.xlu0 %830 }
 0x408   :  { %1256 = vpow2.f32 %v860_v13  ;;  %v858_v16 = vmul.f32 1.442695, %v844_v14  ;;  %v843_v17 = vsub.f32 %v800_v55, %v831_v15  ;;  %v902_v13 = vld [vmem:[%s1649_s5] sm:$0xff]  ;;  %s1430_s5 = smov [#allocation12]  }
 0x409   :  { %v825_v18 = vpop.xlane.xlu1 %824  ;;  %s1081_s8 = sshll.u32 %s1430_s5, 4  ;;  %s1082_s8 = int_to_ptr.vmem [resolvable:$true] %s1081_s8 }
 0x40a   :  { %1258 = vpow2.f32 %v858_v16  ;;  %v856_v19 = vmul.f32 1.442695, %v843_v17  ;;  %v841_v21 = vsub.f32 %v790_v59, %v825_v18  ;;  %s1388_s9 = scalar_lea.vmem %s1082_s8, 128  ;;  %p1393_p12 = scmp.lt.s32.totalorder %s1082_s8, %s1082_s8 }
 0x40b   :  { %v828_v22 = vpop.xlane.xlu0 %827  ;;  %p1389_p11 = scmp.ne.s32.totalorder %s1082_s8, %s1388_s9  ;;  %p1394_p13 = scmp.lt.s32.totalorder %s1388_s9, %s1388_s9 }
 0x40c   :  { %1260 = vpow2.f32 %v856_v19  ;;  %v852_v24 = vmul.f32 1.442695, %v841_v21  ;;  %v842_v25 = vsub.f32 %v795_v62, %v828_v22 }
 0x40d   :  { %v819_v26 = vpop.xlane.xlu1 %818  ;;  %p1395_p0 = por %p1394_p13, %p1393_p12 }
 0x40e   :  { %1262 = vpow2.f32 %v852_v24  ;;  %v854_v28 = vmul.f32 1.442695, %v842_v25  ;;  %v839_v35 = vsub.f32 %v780_v1, %v819_v26  ;;  %v976_v24 = vld [vmem:[#allocation11] sm:$0xff] }
 0x40f   :  { %v822_v36 = vpop.xlane.xlu0 %821  ;;  %p1396_p1 = pnand %p1395_p0, %p1389_p11 }
 0x410   :  { %1264 = vpow2.f32 %v854_v28  ;;  %v848_v37 = vmul.f32 1.442695, %v839_v35  ;;  %v840_v39 = vsub.f32 %v785_v3, %v822_v36 }
 0x412   :  { %1266 = vpow2.f32 %v848_v37  ;;  %v850_v40 = vmul.f32 1.442695, %v840_v39 }
 0x413   :  { %v816_v23 = vpop.xlane.xlu0 %815 }
 0x414   :  { %1268 = vpow2.f32 %v850_v40  ;;  %v838_v41 = vsub.f32 %v775_v7, %v816_v23 }
 0x415   :  { %v1257_v42 = vpop.eup %1256 }
 0x416   :  { %v846_v43 = vmul.f32 1.442695, %v838_v41  ;;  %v883_v44 = vsel %vm813_vm1, %v1257_v42, 0.0 }
 0x417   :  { %v1259_v45 = vpop.eup %1258  ;;  %884 = vadd.xlane.f32.xlu1 %v883_v44 }
 0x418   :  { %1270 = vpow2.f32 %v846_v43  ;;  %v880_v38 = vsel %vm813_vm1, %v1259_v45, 0.0 }
 0x419   :  { %v1261_v46 = vpop.eup %1260  ;;  %881 = vadd.xlane.f32.xlu0 %v880_v38 }
 0x41a   :  { %v877_v47 = vsel %vm813_vm1, %v1261_v46, 0.0 }
 0x41b   :  { %v1263_v48 = vpop.eup %1262  ;;  %878 = vadd.xlane.f32.xlu1 %v877_v47 }
 0x41c   :  { %v871_v50 = vsel %vm813_vm1, %v1263_v48, 0.0 }
 0x41d   :  { %v1265_v49 = vpop.eup %1264 }
 0x41e   :  { %v874_v51 = vsel %vm813_vm1, %v1265_v49, 0.0 }
 0x41f   :  { %v1592_v52 = vpop.eup %1266  ;;  %872 = vadd.xlane.f32.xlu1 %v871_v50  ;;  %875 = vadd.xlane.f32.xlu0 %v874_v51 }
 0x420   :  { %v865_v54 = vsel %vm813_vm1, %v1592_v52, 0.0 }
 0x421   :  { %v1269_v53 = vpop.eup %1268 }
 0x422   :  { %v868_v55 = vsel %vm813_vm1, %v1269_v53, 0.0 }
 0x423   :  { %866 = vadd.xlane.f32.xlu1 %v865_v54  ;;  %869 = vadd.xlane.f32.xlu0 %v868_v55 }
 0x425   :  { %v1271_v56 = vpop.eup %1270 }
 0x426   :  { %v862_v57 = vsel %vm813_vm1, %v1271_v56, 0.0 }
 0x427   :  { %863 = vadd.xlane.f32.xlu0 %v862_v57 }
 0x434   :  { %991 = vrot.lane.b32.xlu1 %v1527_v27, %s1424_s21 }
 0x438   :  { %987 = vrot.lane.b32.xlu1 %v1529_v29, %s1424_s21 }
 0x43c   :  { %985 = vrot.lane.b32.xlu1 %v1535_v31, %s1424_s21 }
 0x43d   :  { %989 = vrot.lane.b32.xlu0 %v1532_v30, %s1424_s21 }
 0x440   :  { %981 = vrot.lane.b32.xlu1 %v1541_v33, %s1424_s21 }
 0x441   :  { %983 = vrot.lane.b32.xlu0 %v1538_v32, %s1424_s21 }
 0x444   :  { %977 = vrot.lane.b32.xlu1 %v1523_v20, %s1424_s21 }
 0x445   :  { %979 = vrot.lane.b32.xlu0 %v1544_v34, %s1424_s21 }
 0x4a0   :  { %v885_v27 = vpop.xlane.xlu1 %884 }
 0x4a1   :  { %1272 = vrcp.f32 %v885_v27 }
 0x4a2   :  { %v882_v29 = vpop.xlane.xlu0 %881 }
 0x4a3   :  { %1274 = vrcp.f32 %v882_v29 }
 0x4a4   :  { %v879_v30 = vpop.xlane.xlu1 %878 }
 0x4a5   :  { %1276 = vrcp.f32 %v879_v30 }
 0x4a8   :  { %v873_v31 = vpop.xlane.xlu1 %872  ;;  %v876_v33 = vpop.xlane.xlu0 %875 }
 0x4a9   :  { %1278 = vrcp.f32 %v873_v31 }
 0x4aa   :  { %1280 = vrcp.f32 %v876_v33 }
 0x4ac   :  { %v867_v32 = vpop.xlane.xlu1 %866  ;;  %v870_v59 = vpop.xlane.xlu0 %869 }
 0x4ad   :  { %1282 = vrcp.f32 %v867_v32 }
 0x4ae   :  { %v1273_v60 = vpop.eup %1272  ;;  %1284 = vrcp.f32 %v870_v59 }
 0x4af   :  { %v901_v61 = vmul.f32 %v1273_v60, %v1257_v42 }
 0x4b0   :  { %v1275_v20 = vpop.eup %1274  ;;  %v864_v62 = vpop.xlane.xlu0 %863 }
 0x4b1   :  { %1286 = vrcp.f32 %v864_v62  ;;  %1200 = vmatpush3.msra.mxu0 %v901_v61  ;;  %v900_v34 = vmul.f32 %v1275_v20, %v1259_v45  ;;  %v992_v4 = vpop.permute.xlu1 %991 }
 0x4b2   :  { %v1277_v63 = vpop.eup %1276  ;;  %1201 = vmatprep.subr.mxu0 %v1428_v58 }
 0x4b3   :  { %1202 = vmatpush3.msra.mxu0 %v900_v34  ;;  %v899_v0 = vmul.f32 %v1277_v63, %v1261_v46 }
 0x4b4   :  { %1203 = vmatprep.subr.mxu0 %v1428_v58  ;;  %v990_v14 = vpop.permute.xlu0 %989 }
 0x4b5   :  { %1204 = vmatpush3.msra.mxu0 %v899_v0  ;;  %v988_v11 = vpop.permute.xlu1 %987 }
 0x4b6   :  { %v1279_v1 = vpop.eup %1278  ;;  %1205 = vmatprep.subr.mxu0 %v1428_v58 }
 0x4b7   :  { %v1281_v2 = vpop.eup %1280  ;;  %v897_v6 = vmul.f32 %v1279_v1, %v1263_v48 }
 0x4b8   :  { %v898_v3 = vmul.f32 %v1281_v2, %v1265_v49  ;;  %v984_v16 = vpop.permute.xlu0 %983 }
 0x4b9   :  { %v986_v15 = vpop.permute.xlu1 %985 }
 0x4ba   :  { %v1283_v5 = vpop.eup %1282  ;;  %1206 = vmatpush3.msra.mxu0 %v898_v3 }
 0x4bb   :  { %v1285_v7 = vpop.eup %1284  ;;  %1207 = vmatprep.subr.mxu0 %v1428_v58  ;;  %v895_v10 = vmul.f32 %v1283_v5, %v1592_v52 }
 0x4bc   :  { %1208 = vmatpush3.msra.mxu0 %v897_v6  ;;  %v896_v8 = vmul.f32 %v1285_v7, %v1269_v53  ;;  %v980_v18 = vpop.permute.xlu0 %979 }
 0x4bd   :  { %1209 = vmatprep.subr.mxu0 %v1428_v58  ;;  %v982_v17 = vpop.permute.xlu1 %981 }
 0x4be   :  { %v1287_v9 = vpop.eup %1286  ;;  %1210 = vmatpush3.msra.mxu0 %v896_v8 }
 0x4bf   :  { %1211 = vmatprep.subr.mxu0 %v1428_v58  ;;  %v894_v12 = vmul.f32 %v1287_v9, %v1271_v56 }
 0x4c0   :  { %1212 = vmatpush3.msra.mxu0 %v895_v10 }
 0x4c1   :  { %1213 = vmatprep.subr.mxu0 %v1428_v58  ;;  %v978_v19 = vpop.permute.xlu1 %977 }
 0x4c2   :  { %1214 = vmatpush3.msra.mxu0 %v894_v12 }
 0x4c3   :  { %1216 = vmatmul.mubr.msk.f32.vlgmr.msra.gmra.mxu0 %vm813_vm1, %v902_v13  ;;  %1218 = vmatprep.subr.mxu0 %v1428_v58 }
 0x4c4   :  { %1219 = vmatpush3.msra.mxu0 %v992_v4  ;;  %1234 = vmatprep.mubr.msk.f32.mxu0 %vm1429_vm2, %v1428_v58 }
 0x4c5   :  { %1220 = vmatprep.subr.mxu0 %v1428_v58 }
 0x4c6   :  { %1221 = vmatpush3.msra.mxu0 %v990_v14 }
 0x4c7   :  { %1222 = vmatprep.subr.mxu0 %v1428_v58 }
 0x4c8   :  { %1223 = vmatpush3.msra.mxu0 %v988_v11 }
 0x4c9   :  { %1224 = vmatprep.subr.mxu0 %v1428_v58 }
 0x4ca   :  { %1225 = vmatpush3.msra.mxu0 %v986_v15 }
 0x4cb   :  { %1226 = vmatprep.subr.mxu0 %v1428_v58 }
 0x4cc   :  { %1227 = vmatpush3.msra.mxu0 %v984_v16 }
 0x4cd   :  { %1228 = vmatprep.subr.mxu0 %v1428_v58 }
 0x4ce   :  { %1229 = vmatpush3.msra.mxu0 %v982_v17 }
 0x4cf   :  { %1230 = vmatprep.subr.mxu0 %v1428_v58 }
 0x4d0   :  { %1231 = vmatpush3.msra.mxu0 %v980_v18 }
 0x4d1   :  { %1232 = vmatprep.subr.mxu0 %v1428_v58 }
 0x4d2   :  { %1233 = vmatpush3.msra.mxu0 %v978_v19 }
 0x583   :  { %v972_v21 = vpop.f32.mrf.mxu0 }
 0x584   :  { %1235 = vmatmul.mubr.msk.f32.vlgmr.msra.gmra.mxu0 %vm813_vm1, %v972_v21 }
 0x585   :  { %v1217_v22 = vpop.f32.mrf.mxu0 }
 0x644   :  { %v1070_v25 = vpop.f32.mrf.mxu0 }
 0x645   :  { %v1071_v26 = vadd.f32 %v1070_v25, %v976_v24 }
 0x646   :  { %v1236_v28 = vpop.f32.mrf.mxu0 }
 0x647   :  { %1074 = vst.msk [vmem:[#allocation12] sm:$0xff] %vm152_vm0, %v1071_v26 }
 0x648   :  { %1399 = shalt.err (!%p1396_p1)
}
 0x649   :  { %1084 = dma.vmem_to_hbm [thread:$0]  %s1082_s8, 128, %s1651_s7, [#allocation5]  }
 0x64a   :  { %1414 = dma.done.wait [#allocation5], 128  }
 0x64b   :  { %1415 = vsyncadd [#allocation5], 4294967168 }
 0x64c   :  { %1088 = vsyncpa [#allocation4], 1 }
 0x64d   :  { %1089 = vsyncpa [#allocation7], 1 }
 0x64e   :  { %1090 = vsyncpa [#allocation10], 1 }
 0x64f   :  { %1091 = vsyncpa [#allocation5], 1 }

</bundles_post_ra>
